<compile_context>
chip_gen: v7x
topology: tpu7x:2x2x1
jax: 0.10.0
libtpu: 0.0.40
codegen_flags: <defaults>
</compile_context>

<pallas_src>
import functools

import jax
import jax.numpy as jnp
from jax.experimental import pallas as pl
from jax.experimental.pallas import tpu as pltpu

HIDDEN = 32          # config.hidden_size (small test size)
NUM_CLASSES = 2      # nn.Linear(hidden_size, 2)
DROPOUT = 0.1        # dropout prob passed to the module


def _round_up(x, m):
    return (x + m - 1) // m * m


def _linear_bias_kernel(x_ref, w_ref, b_ref, o_ref):
    """o = x @ W^T + b for one row-block (eval mode: dropout is identity)."""
    y = jnp.dot(x_ref[...], w_ref[...], preferred_element_type=jnp.float32)
    y = y + b_ref[...].astype(jnp.float32)
    o_ref[...] = y.astype(o_ref.dtype)


def _linear_bias_dropout_kernel(x_ref, w_ref, b_ref, r_ref, o_ref, *, p_drop):
    """o = inverted_dropout(x @ W^T + b) for one row-block."""
    y = jnp.dot(x_ref[...], w_ref[...], preferred_element_type=jnp.float32)
    y = y + b_ref[...].astype(jnp.float32)
    # Integer-domain threshold: drop with prob p  <=>  bits < round(p * 2^32).
    threshold = jnp.uint32(min(int(round(p_drop * (1 << 32))), (1 << 32) - 1))
    keep = r_ref[...] >= threshold
    y = jnp.where(keep, y * (1.0 / (1.0 - p_drop)), 0.0)
    o_ref[...] = y.astype(o_ref.dtype)


def _choose_row_block(M, cap=4096):
    # Tiny batches: one full-extent block (no sublane-alignment constraint).
    # Larger batches: 16-aligned blocks (bf16-safe), capped at `cap`, and at
    # least 2 blocks so the "parallel" grid axis can shard across v7x's 2 TCs.
    if M <= 16:
        return M
    return min(cap, _round_up(pl.cdiv(M, 2), 16))


@functools.partial(jax.jit, static_argnames=("p_drop", "training"))
def bert_only_nps_head(pooled_output, weight_t, bias, dropout_key=None,
                       *, p_drop=DROPOUT, training=False):
    """pooled_output: (B, H); weight_t: (H, 2) == torch weight.T; bias: (2,)."""
    M, H = pooled_output.shape
    N = weight_t.shape[1]
    bm = _choose_row_block(M)
    grid = (pl.cdiv(M, bm),)

    bias2d = bias.reshape(1, N)
    use_dropout = bool(training) and p_drop > 0.0

    x_spec = pl.BlockSpec((bm, H), lambda i: (i, 0))
    w_spec = pl.BlockSpec((H, N), lambda i: (0, 0))
    b_spec = pl.BlockSpec((1, N), lambda i: (0, 0))
    o_spec = pl.BlockSpec((bm, N), lambda i: (i, 0))
    out_shape = jax.ShapeDtypeStruct((M, N), pooled_output.dtype)
    cparams = pltpu.CompilerParams(dimension_semantics=("parallel",))

    if not use_dropout:
        return pl.pallas_call(
            _linear_bias_kernel,
            out_shape=out_shape,
            grid=grid,
            in_specs=[x_spec, w_spec, b_spec],
            out_specs=o_spec,
            compiler_params=cparams,
        )(pooled_output, weight_t, bias2d)

    if dropout_key is None:
        raise ValueError("dropout_key is required when training with p_drop > 0")
    # Tiny (M, 2) uint32 array: generating it outside the kernel keeps the
    # kernel free of TPU-only PRNG primitives and adds negligible HBM traffic
    # compared with the (M, H) activation stream.
    rbits = jax.random.bits(dropout_key, (M, N), dtype=jnp.uint32)
    r_spec = pl.BlockSpec((bm, N), lambda i: (i, 0))
    kernel = functools.partial(_linear_bias_dropout_kernel, p_drop=p_drop)
    return pl.pallas_call(
        kernel,
        out_shape=out_shape,
        grid=grid,
        in_specs=[x_spec, w_spec, b_spec, r_spec],
        out_specs=o_spec,
        compiler_params=cparams,
    )(pooled_output, weight_t, bias2d, rbits)
    # TODO(synk): for real BERT widths (H=768+, bf16) add a K-tiled fp32
    # accumulator and re-derive bm against v7x's 64 MiB VMEM (cap bm<=4096 or
    # set vmem_limit_bytes explicitly).


if __name__ == "__main__":
    key = jax.random.PRNGKey(0)
    kx, kw, kb, kd = jax.random.split(key, 4)

    B = 2
    pooled = jax.random.normal(kx, (B, HIDDEN), jnp.float32)
    # torch nn.Linear(hidden, 2).weight has shape (2, hidden); we store W^T.
    weight_t = jax.random.normal(kw, (HIDDEN, NUM_CLASSES), jnp.float32) * 0.02
    bias = jax.random.normal(kb, (NUM_CLASSES,), jnp.float32) * 0.02

    out_eval = bert_only_nps_head(pooled, weight_t, bias,
                                  p_drop=DROPOUT, training=False)
    out_train = bert_only_nps_head(pooled, weight_t, bias, kd,
                                   p_drop=DROPOUT, training=True)

    # Larger, non-multiple-of-16 batch exercises the multi-block "parallel"
    # grid and the ragged (masked) tail block.
    B2 = 300
    pooled_big = jax.random.normal(jax.random.PRNGKey(7), (B2, HIDDEN),
                                   jnp.float32)
    out_big = bert_only_nps_head(pooled_big, weight_t, bias,
                                 p_drop=DROPOUT, training=False)

    jax.block_until_ready((out_eval, out_train, out_big))

    # Reference: eval-mode dropout is identity.
    ref = pooled @ weight_t + bias
    ref_big = pooled_big @ weight_t + bias
    assert out_eval.shape == (B, NUM_CLASSES)
    assert out_train.shape == (B, NUM_CLASSES)
    assert out_big.shape == (B2, NUM_CLASSES)
    assert bool(jnp.allclose(out_eval, ref, atol=1e-5, rtol=1e-5))
    assert bool(jnp.allclose(out_big, ref_big, atol=1e-5, rtol=1e-5))
    # Training-mode outputs are either dropped (0) or scaled by 1/(1-p).
    scaled = ref / (1.0 - DROPOUT)
    ok = jnp.all((out_train == 0.0) | (jnp.abs(out_train - scaled) < 1e-4))
    assert bool(ok)
    assert bool(jnp.all(jnp.isfinite(out_train)))
    print("KERNEL_OK")
</pallas_src>

<mosaic_0001>
module attributes {stable_mosaic.version = 11 : i64} {
  func.func @_linear_bias_kernel(%arg0: i32, %arg1: memref<2x32xf32, #tpu.memory_space<vmem>>, %arg2: memref<32x2xf32, #tpu.memory_space<vmem>>, %arg3: memref<1x2xf32, #tpu.memory_space<vmem>>, %arg4: memref<2x2xf32, #tpu.memory_space<vmem>>) attributes {dimension_semantics = [#tpu.dimension_semantics<parallel>], iteration_bounds = array<i64: 1>, scalar_prefetch = 0 : i64, scratch_operands = 0 : i64, tpu.core_type = #tpu.core_type<tc>, window_params = [{transform_indices = @transform_0, window_bounds = array<i64: 2, 32>}, {pipeline_mode = #tpu.pipeline_mode<synchronous>, transform_indices = @transform_1, window_bounds = array<i64: 32, 2>}, {pipeline_mode = #tpu.pipeline_mode<synchronous>, transform_indices = @transform_2, window_bounds = array<i64: 1, 2>}, {transform_indices = @transform_3, window_bounds = array<i64: 2, 2>}]} {
    %c0 = arith.constant 0 : index
    %c0_0 = arith.constant 0 : index
    %0 = vector.load %arg1[%c0, %c0_0] : memref<2x32xf32, #tpu.memory_space<vmem>>, vector<2x32xf32>
    %c0_1 = arith.constant 0 : index
    %c0_2 = arith.constant 0 : index
    %1 = vector.load %arg2[%c0_1, %c0_2] : memref<32x2xf32, #tpu.memory_space<vmem>>, vector<32x2xf32>
    %cst = arith.constant dense<0.000000e+00> : vector<2x2xf32>
    %2 = tpu.matmul %0, %1, %cst {dimension_numbers = #tpu.dot_dimension_numbers<[1], [0], [0], [1], [0, 0, 1, 1], [], []>} : vector<2x32xf32>, vector<32x2xf32>, vector<2x2xf32> -> vector<2x2xf32>
    %c0_3 = arith.constant 0 : index
    %c0_4 = arith.constant 0 : index
    %3 = vector.load %arg3[%c0_3, %c0_4] : memref<1x2xf32, #tpu.memory_space<vmem>>, vector<1x2xf32>
    %4 = vector.broadcast %3 : vector<1x2xf32> to vector<2x2xf32>
    %5 = arith.addf %2, %4 : vector<2x2xf32>
    %c0_5 = arith.constant 0 : index
    %c0_6 = arith.constant 0 : index
    %6 = vector.load %arg4[%c0_5, %c0_6] : memref<2x2xf32, #tpu.memory_space<vmem>>, vector<2x2xf32>
    tpu.vector_store %arg4[%c0_5, %c0_6], %5 {strides = array<i32>} : memref<2x2xf32, #tpu.memory_space<vmem>>, vector<2x2xf32>,
    return
  }
  func.func @transform_0(%arg0: i32) -> (i32, i32) {
    %c0_i32 = arith.constant 0 : i32
    %c0_i32_0 = arith.constant 0 : i32
    return %arg0, %c0_i32 : i32, i32
  }
  func.func @transform_1(%arg0: i32) -> (i32, i32) {
    %c0_i32 = arith.constant 0 : i32
    %c0_i32_0 = arith.constant 0 : i32
    %c0_i32_1 = arith.constant 0 : i32
    return %c0_i32, %c0_i32_0 : i32, i32
  }
  func.func @transform_2(%arg0: i32) -> (i32, i32) {
    %c0_i32 = arith.constant 0 : i32
    %c0_i32_0 = arith.constant 0 : i32
    %c0_i32_1 = arith.constant 0 : i32
    return %c0_i32, %c0_i32_0 : i32, i32
  }
  func.func @transform_3(%arg0: i32) -> (i32, i32) {
    %c0_i32 = arith.constant 0 : i32
    %c0_i32_0 = arith.constant 0 : i32
    return %arg0, %c0_i32 : i32, i32
  }
}

</mosaic_0001>

<bundles_post_ra>
// kernel: bert_only_nps_head.1
= control target key start
LH: loop header
LB: loop body
LE: loop exit
PB: predicated region body
PF: predicated region fallthrough
CT: control target
= control target key end

     0   :  { %v169_v3 = vmov 0.0|0.0   ;;  %vm170_vm0 = vmmov 0   ;;  %v171_v6 = vmov 0.0   ;;  %s223_s0 = inlined_call_operand.vmem [shape: f32[2,32], index: 0, kind: input, shape index: {}]   ;;  %s224_s1 = inlined_call_operand.vmem [shape: f32[32,2], index: 1, kind: input, shape index: {}]   ;;  %s225_s2 = inlined_call_operand.vmem [shape: f32[1,2], index: 2, kind: input, shape index: {}]   ;;  %s226_s3 = inlined_call_operand.hbm [shape: f32[2,2], index: 3, kind: output, shape index: {}]  }
   0x1   :  { %v16_v0 = vld [vmem:[%s224_s1] sm:$0xff]  ;;  %v17_v1 = vld [vmem:[%s224_s1 + $0x8] sm:$0xff]  ;;  %v18_v2 = vld [vmem:[%s224_s1 + $0x10] sm:$0xff]  ;;  %135 = vmatprep.subr.bf16.mxu0 %v169_v3  ;;  %132 = vmatprep.mubr.msk.f32.mxu0 %vm170_vm0, %v171_v6 }
   0x2   :  { %v136_v4 = vpack.c.bf16 %v17_v1, %v16_v0  ;;  %v19_v5 = vld [vmem:[%s224_s1 + $0x18] sm:$0xff] }
   0x3   :  { %8 = vsyncpa [#allocation3], 0  ;;  %v139_v7 = vpack.c.bf16 %v19_v5, %v18_v2  ;;  %v15_v8 = vld [vmem:[%s223_s0] sm:$0x3]  ;;  %vm27_vm1 = vcmask 261120   ;;  %s172_s24 = smov [#allocation2]  }
   0x4   :  { %137 = vmatpush3.bf16.msra.mxu0 %v136_v4  ;;  %v117_v9 = vld [vmem:[%s225_s2] ss:$0 sm:$0xff]  ;;  %s109_s1 = sshll.u32 %s172_s24, 4  ;;  %vm101_vm2 = vcmask 9216   ;;  %s110_s1 = int_to_ptr.vmem [resolvable:$true] %s109_s1 }
   0x5   :  { %138 = vmatprep.subr.bf16.mxu0 %v169_v3  ;;  %s145_s25 = scalar_lea.vmem %s110_s1, 32  ;;  %p150_p1 = scmp.lt.s32.totalorder %s110_s1, %s110_s1 }
   0x6   :  { %p146_p0 = scmp.ne.s32.totalorder %s110_s1, %s145_s25  ;;  %p151_p2 = scmp.lt.s32.totalorder %s145_s25, %s145_s25 }
   0x8   :  { %140 = vmatpush3.bf16.msra.mxu0 %v139_v7  ;;  %p152_p3 = por %p151_p2, %p150_p1 }
   0xa   :  { %p153_p4 = pnand %p152_p3, %p146_p0 }
   0xb   :  { %133 = vmatmul.mubr.msk.f32.vlgmr.msra.gmra.mrb[0].mxu0 %vm27_vm1, %v15_v8 }
  0xde   :  { %v97_v10 = vpop.f32.mrb[0].mxu0 }
  0xdf   :  { %v98_v11 = vadd.f32 %v117_v9, %v97_v10  ;;  %v134_v12 = vpop.f32.mrb[1].mxu0 }
  0xe1   :  { %102 = vst.msk [vmem:[#allocation2] sm:$0x3] %vm101_vm2, %v98_v11 }
  0xe2   :  { %156 = shalt.err (!%p153_p4)
}
  0xe3   :  { %s157_s27 = scalar_lea.hbm %s226_s3, 32 }
  0xe4   :  { %p158_p5 = scmp.ne.s32.totalorder %s226_s3, %s157_s27  ;;  %p161_p6 = scmp.lt.u32.totalorder %s157_s27, %s226_s3 }
  0xe6   :  { %p163_p7 = pnand %p161_p6, %p158_p5 }
  0xe8   :  { %166 = shalt.err (!%p163_p7)
}
  0xe9   :  { %112 = dma.vmem_to_hbm [thread:$0]  %s110_s1, 32, %s226_s3, [#allocation3]  }
  0xea   :  { %167 = dma.done.wait [#allocation3], 32  }
  0xeb   :  { %168 = vsyncadd [#allocation3], 4294967264 }
  0xec   :  { %116 = vsyncpa [#allocation3], 1 }

</bundles_post_ra>
